<compile_context>
chip_gen: v5e
topology: v5e:2x2
jax: 0.10.0
libtpu: 0.0.40
codegen_flags: <defaults>
</compile_context>

<pallas_src>
import jax
import jax.numpy as jnp
import numpy as np
from jax.experimental import pallas as pl
from jax.experimental.pallas import tpu as pltpu

_GN_GROUPS = 30
_EPS = 1e-5
_C_IN, _C_IN_PAD = 192, 256
# (real channels, padded lane width, GroupNorm channels-per-group) per stage.
_STAGES = (
    (60, 128, 2),    # stage A: conv0 output / glayer
    (120, 128, 4),   # stage B: layer1
    (240, 256, 8),   # stage C: layer2
    (480, 512, 16),  # stage D: final GroupNorm / head
)


# -----------------------------------------------------------------------------
# pltpu.roll direction probe (run once, outside any jit trace)
# -----------------------------------------------------------------------------
_ROLL_SIGN = None


def _roll_sign():
    """+1 if pltpu.roll follows the jnp.roll convention (y[i] = x[i - shift]),
    -1 if it is the inverse.  Makes the conv tap shifts direction-proof."""
    global _ROLL_SIGN
    if _ROLL_SIGN is None:
        def k(x_ref, o_ref):
            o_ref[...] = pltpu.roll(x_ref[...], shift=1, axis=0)

        x = jnp.arange(8 * 128, dtype=jnp.float32).reshape(8, 128)
        y = pl.pallas_call(
            k, out_shape=jax.ShapeDtypeStruct((8, 128), jnp.float32))(x)
        if float(y[1, 0]) == 0.0:
            _ROLL_SIGN = 1
        elif float(y[0, 0]) == 128.0:
            _ROLL_SIGN = -1
        else:
            raise RuntimeError("unexpected pltpu.roll semantics")
    return _ROLL_SIGN


# -----------------------------------------------------------------------------
# Weight preparation (host-side, done once at init time)
# -----------------------------------------------------------------------------
def _standardize(w):
    """Weight standardization from the reference Conv2d.forward.
    w: (Cout, Cin_per_group, 3, 3) f32."""
    mean = w.mean(axis=(1, 2, 3), keepdims=True)
    w = w - mean
    std = jnp.std(w.reshape(w.shape[0], -1), axis=1,
                  ddof=1).reshape(-1, 1, 1, 1) + 1e-5       # torch: unbiased
    return w / std


def _fold_shuffle(p_prev, shuffle):
    """Given the previous stage's semantic->physical-lane map (shared by `cat`
    and `x`), return the new stage's map for the in-kernel layout
    concat([cat[:, :C_prev], x[:, :C_prev], zeros])."""
    p_prev = np.asarray(p_prev)
    c_prev = p_prev.shape[0]
    if not shuffle:
        return np.concatenate([p_prev, c_prev + p_prev])
    chunk = c_prev // 3
    parts = []
    for t in (0, 3, 1, 4, 2, 5):                 # torch block permutation
        if t < 3:
            parts.append(p_prev[t * chunk:(t + 1) * chunk])
        else:
            parts.append(c_prev + p_prev[(t - 3) * chunk:(t - 2) * chunk])
    return np.concatenate(parts)


def _prep_conv(w, groups, p_in, w_in, p_out, w_out):
    """Standardize a torch-layout (Cout, Cin/g, 3, 3) weight, expand the
    grouped weight to dense block-diagonal form, scatter rows/cols into the
    PHYSICAL (padded + shuffle-folded) channel layout, and reshape to
    (9*w_in, w_out) bf16 with (kh, kw, lane_in) row ordering (matches the
    in-kernel tap concat)."""
    ws = np.asarray(_standardize(w), np.float32)
    cout, cin_pg, kh, kw = ws.shape
    cout_pg = cout // groups
    cin = cin_pg * groups
    w_k = np.transpose(ws, (2, 3, 1, 0)).reshape(kh * kw, cin_pg, cout)
    dense_sem = np.zeros((kh * kw, cin, cout), np.float32)
    for g in range(groups):
        dense_sem[:, g * cin_pg:(g + 1) * cin_pg,
                  g * cout_pg:(g + 1) * cout_pg] = \
            w_k[:, :, g * cout_pg:(g + 1) * cout_pg]
    dense_phys = np.zeros((kh * kw, w_in, w_out), np.float32)
    dense_phys[:, np.asarray(p_in)[:, None], np.asarray(p_out)[None, :]] = dense_sem
    return jnp.asarray(dense_phys.reshape(kh * kw * w_in, w_out),
                       dtype=jnp.bfloat16)


def _gn_indicators(p, c, width, num_groups=_GN_GROUPS):
    """0/1 indicator matrices mapping physical lanes <-> GroupNorm groups."""
    cpg = c // num_groups
    mcg = np.zeros((width, num_groups), np.float32)
    mcg[np.asarray(p), np.arange(c) // cpg] = 1.0
    return jnp.asarray(mcg), jnp.asarray(np.ascontiguousarray(mcg.T))


def init_raw_params(key):
    """Raw torch-layout f32 weights (reference + kernel share these)."""
    keys = iter(jax.random.split(key, 64))

    def conv_w(cout, cin_pg):
        # TODO(synk): reference uses nn.init.orthogonal_; weight
        # standardization makes the forward insensitive to the init scale.
        return jax.random.normal(next(keys), (cout, cin_pg, 3, 3),
                                 jnp.float32) * 0.1

    raw = {"conv0_1": conv_w(60, 192 // 3)}
    raw["glayer"] = [(conv_w(60, 20), conv_w(60, 20)) for _ in range(3)]
    raw["layer1"] = [(conv_w(120, 40), conv_w(120, 40)) for _ in range(3)]
    raw["layer2"] = [(conv_w(240, 240), conv_w(240, 240)) for _ in range(3)]
    raw["fc_w"] = jax.random.normal(next(keys), (1, 480), jnp.float32) * 0.05
    raw["fc_b"] = jax.random.normal(next(keys), (1,), jnp.float32) * 0.1
    return raw


def prepare_params(raw):
    """Kernel-ready params: bf16 padded/permuted conv weights, GN indicator
    matrices and the physically-permuted fc weight."""
    _roll_sign()                       # warm the roll-direction probe (eager)
    p_in = np.arange(_C_IN)
    p_a = np.arange(60)
    p_b = _fold_shuffle(p_a, shuffle=True)     # layer1 layout (shuffle folded)
    p_c = _fold_shuffle(p_b, shuffle=True)     # layer2 layout
    p_d = _fold_shuffle(p_c, shuffle=False)    # final cat layout

    conv_ws = [_prep_conv(raw["conv0_1"], 3, p_in, _C_IN_PAD, p_a, 128)]
    for w1, w2 in raw["glayer"]:
        conv_ws += [_prep_conv(w1, 3, p_a, 128, p_a, 128),
                    _prep_conv(w2, 3, p_a, 128, p_a, 128)]
    for w1, w2 in raw["layer1"]:
        conv_ws += [_prep_conv(w1, 3, p_b, 128, p_b, 128),
                    _prep_conv(w2, 3, p_b, 128, p_b, 128)]
    for w1, w2 in raw["layer2"]:
        conv_ws += [_prep_conv(w1, 1, p_c, 256, p_c, 256),
                    _prep_conv(w2, 1, p_c, 256, p_c, 256)]

    gn = []
    for p, (c, width, _) in zip((p_a, p_b, p_c, p_d), _STAGES):
        gn += list(_gn_indicators(p, c, width))

    fc_w = np.zeros((1, _STAGES[3][1]), np.float32)
    fc_w[0, p_d] = np.asarray(raw["fc_w"], np.float32)[0]
    fc_b = np.asarray(raw["fc_b"], np.float32).reshape(1, 1)
    return {"conv_ws": conv_ws, "gn": gn,
            "fc_w": jnp.asarray(fc_w), "fc_b": jnp.asarray(fc_b)}


# -----------------------------------------------------------------------------
# Fused whole-network Pallas kernel
# -----------------------------------------------------------------------------
def _fsnet_pallas(x2d, bs, sp_h, sp_w, params):
    """x2d: (bs*sp_h*sp_w, 256) f32 (192 real channels + zero pad).
    Returns sigmoid(logit): (bs, 1) f32."""
    HW = sp_h * sp_w
    assert HW % 8 == 0
    if bs % 4 == 0 and bs >= 8:
        S = 4          # M = 4*HW: fills the 256-row MXU on v6e/v7x
    elif bs % 2 == 0:
        S = 2          # M = 2*HW = 128: v5e-sized, keeps >=2 grid steps
    else:
        S = 1
    steps = bs // S
    M = S * HW
    sign = _roll_sign()

    conv_ws, gn = params["conv_ws"], params["gn"]
    fc_w, fc_b = params["fc_w"], params["fc_b"]
    n_w = len(conv_ws)
    c0p = x2d.shape[1]

    def kernel(*refs):
        x_ref = refs[0]
        w_refs = refs[1:1 + n_w]
        gn_refs = refs[1 + n_w:1 + n_w + 8]
        fcw_ref = refs[1 + n_w + 8]
        fcb_ref = refs[1 + n_w + 9]
        o_ref = refs[1 + n_w + 10]

        # Per-row boundary masks, built once for all 19 convs.  Row index
        # r = s*HW + h*W + w; any tap that would cross a sample's spatial
        # border (including across the S stacked samples) is zeroed.
        ridx = jax.lax.broadcasted_iota(jnp.int32, (M, 1), 0)
        local = ridx % HW
        hh = local // sp_w
        ww = local % sp_w
        masks = {}
        for dh in (-1, 0, 1):
            for dw in (-1, 0, 1):
                m = None
                if dh == -1:
                    m = hh >= 1
                elif dh == 1:
                    m = hh <= sp_h - 2
                if dw == -1:
                    m = (ww >= 1) if m is None else jnp.logical_and(m, ww >= 1)
                elif dw == 1:
                    m = (ww <= sp_w - 2) if m is None else \
                        jnp.logical_and(m, ww <= sp_w - 2)
                masks[(dh, dw)] = m

        def conv3x3(a, w_ref):
            """a: (M, Cin_pad) f32 with exact zeros in pad lanes.  im2col via
            pltpu.roll (XLU) + f32 row masks, per-tap bf16 cast, 128-aligned
            concat, one MXU matmul with K = 9*Cin_pad, f32 accumulation."""
            taps = []
            for dh in (-1, 0, 1):
                for dw in (-1, 0, 1):
                    delta = dh * sp_w + dw
                    if delta == 0:
                        sh = a
                    else:
                        sh = pltpu.roll(a, shift=(-sign * delta) % M, axis=0)
                    m = masks[(dh, dw)]
                    t = sh if m is None else jnp.where(m, sh, 0.0)
                    taps.append(t.astype(jnp.bfloat16))
            patch = jnp.concatenate(taps, axis=1)         # (M, 9*Cin_pad) bf16
            return jnp.dot(patch, w_ref[...],
                           preferred_element_type=jnp.float32)

        def groupnorm(a, mcg_ref, mgc_ref, cpg, relu):
            """Per-sample GroupNorm(30) with identity affine (reference init).
            Group stats via one (2S, C)x(C, 30) dot, expand via one
            (2S, 30)x(30, C) dot; all statistics stay in f32.  Padding lanes
            have zero indicator columns -> they stay exactly zero."""
            subs = [a[s * HW:(s + 1) * HW] for s in range(S)]
            s1 = [jnp.sum(t, axis=0, keepdims=True) for t in subs]
            s2 = [jnp.sum(t * t, axis=0, keepdims=True) for t in subs]
            st = jnp.concatenate(s1 + s2, axis=0)                   # (2S, C)
            g = jnp.dot(st, mcg_ref[...], preferred_element_type=jnp.float32)
            n = float(HW * cpg)
            mean_g = g[:S] / n
            var_g = jnp.maximum(g[S:] / n - mean_g * mean_g, 0.0)
            inv_g = jax.lax.rsqrt(var_g + _EPS)
            mi = jnp.concatenate([mean_g, inv_g], axis=0)           # (2S, 30)
            mic = jnp.dot(mi, mgc_ref[...], preferred_element_type=jnp.float32)
            outs = []
            for s in range(S):
                ys = (subs[s] - mic[s:s + 1]) * mic[S + s:S + s + 1]
                outs.append(jnp.maximum(ys, 0.0) if relu else ys)
            return jnp.concatenate(outs, axis=0) if S > 1 else outs[0]

        def resblock(a, w1_ref, w2_ref, mcg_ref, mgc_ref, cpg):
            # TODO(synk): `block` is undefined in the reference; implemented
            # as a pre-activation residual block.
            o = groupnorm(a, mcg_ref, mgc_ref, cpg, True)
            o = conv3x3(o, w1_ref)
            o = groupnorm(o, mcg_ref, mgc_ref, cpg, True)
            o = conv3x3(o, w2_ref)
            return o + a

        def stage_concat(a, b, real, new_width):
            # Channel shuffle is folded into the downstream weight layouts, so
            # only a plain 2-way concat (+ zero pad to a 128-lane multiple)
            # remains in-kernel.
            pad = new_width - 2 * real
            return jnp.concatenate(
                [a[:, :real], b[:, :real],
                 jnp.zeros((M, pad), jnp.float32)], axis=1)

        # ---- forward pass (S samples), everything VMEM/vreg resident -------
        x = x_ref[...]                                    # (M, 256) f32
        cat = conv3x3(x, w_refs[0])                       # (M, 128), 60 real

        wi = 1
        xg = cat
        for _ in range(3):                                # glayer
            xg = resblock(xg, w_refs[wi], w_refs[wi + 1],
                          gn_refs[0], gn_refs[1], _STAGES[0][2])
            wi += 2
        cat = stage_concat(cat, xg, _STAGES[0][0], _STAGES[1][1])

        x1 = cat
        for _ in range(3):                                # layer1
            x1 = resblock(x1, w_refs[wi], w_refs[wi + 1],
                          gn_refs[2], gn_refs[3], _STAGES[1][2])
            wi += 2
        cat = stage_concat(cat, x1, _STAGES[1][0], _STAGES[2][1])

        x2 = cat
        for _ in range(3):                                # layer2
            x2 = resblock(x2, w_refs[wi], w_refs[wi + 1],
                          gn_refs[4], gn_refs[5], _STAGES[2][2])
            wi += 2
        cat = stage_concat(cat, x2, _STAGES[2][0], _STAGES[3][1])

        # final GroupNorm (self.bn) + mean pool + fc + sigmoid (VPU/XLU path)
        y = groupnorm(cat, gn_refs[6], gn_refs[7], _STAGES[3][2], False)
        pooled = jnp.concatenate(
            [jnp.mean(y[s * HW:(s + 1) * HW], axis=0, keepdims=True)
             for s in range(S)], axis=0)                  # (S, 512)
        logit = jnp.sum(pooled * fcw_ref[...], axis=1, keepdims=True) + fcb_ref[...]
        o_ref[...] = jax.nn.sigmoid(logit).reshape(1, S, 1)

    in_specs = [pl.BlockSpec((M, c0p), lambda b: (b, 0))]
    for arr in list(conv_ws) + list(gn) + [fc_w, fc_b]:
        # Constant index_map: each weight is staged into VMEM once and reused
        # by every grid step.  (pl.Buffered(1) could reclaim the second,
        # unused pipeline buffer; left at the default for lowering safety.)
        in_specs.append(pl.BlockSpec(arr.shape, lambda b, nd=arr.ndim: (0,) * nd))

    out = pl.pallas_call(
        kernel,
        out_shape=jax.ShapeDtypeStruct((steps, S, 1), jnp.float32),
        grid=(steps,),
        in_specs=in_specs,
        out_specs=pl.BlockSpec((1, S, 1), lambda b: (b, 0, 0)),
        compiler_params=pltpu.CompilerParams(
            dimension_semantics=("parallel",),
            vmem_limit_bytes=40 * 1024 * 1024),
    )(x2d, *conv_ws, *gn, fc_w, fc_b)
    return out.reshape(bs, 1)


# -----------------------------------------------------------------------------
# Forward-pass wrapper (layout glue only)
# -----------------------------------------------------------------------------
def fsnet_forward(params, im_c, im_q):
    # im_q is accepted but unused, exactly as in the reference forward.
    del im_q
    bs, c1, sp_h, sp_w, c2, c3 = im_c.shape
    assert c1 * c2 * c3 == _C_IN
    x_nchw = jnp.transpose(im_c, (0, 1, 4, 5, 2, 3)).reshape(bs, _C_IN, sp_h, sp_w)
    x = jnp.transpose(x_nchw, (0, 2, 3, 1))               # NHWC (bs, h, w, 192)
    x2d = x.reshape(bs * sp_h * sp_w, _C_IN)
    x2d = jnp.pad(x2d, ((0, 0), (0, _C_IN_PAD - _C_IN)))  # channel pad -> 256
    return _fsnet_pallas(x2d, bs, sp_h, sp_w, params)


# -----------------------------------------------------------------------------
# Pure-JAX f32 reference of the PyTorch forward (validation only)
# -----------------------------------------------------------------------------
def _ref_conv(x, w, groups):
    ws = _standardize(w)
    w_hwio = jnp.transpose(ws, (2, 3, 1, 0))
    return jax.lax.conv_general_dilated(
        x, w_hwio, window_strides=(1, 1), padding="SAME",
        dimension_numbers=("NHWC", "HWIO", "NHWC"),
        feature_group_count=groups)


def _ref_gn(x, num_groups=_GN_GROUPS, eps=_EPS):
    b, h, w, c = x.shape
    g = x.reshape(b, h, w, num_groups, c // num_groups)
    mean = g.mean(axis=(1, 2, 4), keepdims=True)
    var = g.var(axis=(1, 2, 4), keepdims=True)
    return ((g - mean) * jax.lax.rsqrt(var + eps)).reshape(b, h, w, c)


def _ref_block(x, w1, w2, groups):
    o = _ref_conv(jax.nn.relu(_ref_gn(x)), w1, groups)
    o = _ref_conv(jax.nn.relu(_ref_gn(o)), w2, groups)
    return o + x


def _ref_shuffle(cat, x):
    ch = cat.shape[-1] // 3
    parts = []
    for t in range(3):
        parts += [cat[..., t * ch:(t + 1) * ch], x[..., t * ch:(t + 1) * ch]]
    return jnp.concatenate(parts, axis=-1)


def fsnet_reference(raw, im_c):
    bs, c1, sp_h, sp_w, c2, c3 = im_c.shape
    x = jnp.transpose(im_c, (0, 1, 4, 5, 2, 3)).reshape(bs, _C_IN, sp_h, sp_w)
    x = jnp.transpose(x, (0, 2, 3, 1))
    cat = _ref_conv(x, raw["conv0_1"], 3)
    xg = cat
    for w1, w2 in raw["glayer"]:
        xg = _ref_block(xg, w1, w2, 3)
    cat = _ref_shuffle(cat, xg)
    x1 = cat
    for w1, w2 in raw["layer1"]:
        x1 = _ref_block(x1, w1, w2, 3)
    cat = _ref_shuffle(cat, x1)
    x2 = cat
    for w1, w2 in raw["layer2"]:
        x2 = _ref_block(x2, w1, w2, 1)
    cat = jnp.concatenate([cat, x2], axis=-1)
    y = _ref_gn(cat)
    pooled = jnp.mean(y, axis=(1, 2))                     # (bs, 480)
    logit = pooled @ raw["fc_w"].T + raw["fc_b"]
    return jax.nn.sigmoid(logit)


# -----------------------------------------------------------------------------
if __name__ == "__main__":
    key = jax.random.PRNGKey(0)
    k_params, k_c, k_q = jax.random.split(key, 3)

    bs, sp = 4, 8
    # im_c: (bs, 3, w, h, 8, 8) so that 3*8*8 = 192 channels after the view.
    im_c = jax.random.normal(k_c, (bs, 3, sp, sp, 8, 8), jnp.float32)
    im_q = jax.random.normal(k_q, (bs, 3, sp, sp, 8, 8), jnp.float32)  # unused

    raw = init_raw_params(k_params)
    params = prepare_params(raw)

    out = jax.jit(fsnet_forward)(params, im_c, im_q)
    ref = fsnet_reference(raw, im_c)
    out, ref = jax.block_until_ready((out, ref))

    assert out.shape == (bs, 1)
    assert bool(jnp.all(jnp.isfinite(out)))
    max_err = float(jnp.max(jnp.abs(out - ref)))
    assert max_err < 3e-2, f"kernel deviates from reference: {max_err}"
    print("KERNEL_OK")
</pallas_src>

<mosaic_0001>
module attributes {stable_mosaic.version = 11 : i64} {
  func.func @k(%arg0: memref<8x128xf32, #tpu.memory_space<vmem>>, %arg1: memref<8x128xf32, #tpu.memory_space<vmem>>) attributes {dimension_semantics = [], scalar_prefetch = 0 : i64, scratch_operands = 0 : i64, tpu.core_type = #tpu.core_type<tc>} {
    %c0 = arith.constant 0 : index
    %c0_0 = arith.constant 0 : index
    %0 = vector.load %arg0[%c0, %c0_0] : memref<8x128xf32, #tpu.memory_space<vmem>>, vector<8x128xf32>
    %c1_i32 = arith.constant 1 : i32
    %1 = tpu.dynamic_rotate %0 by %c1_i32 dim 0 : vector<8x128xf32>, i32 -> vector<8x128xf32>
    %c0_1 = arith.constant 0 : index
    %c0_2 = arith.constant 0 : index
    %2 = vector.load %arg1[%c0_1, %c0_2] : memref<8x128xf32, #tpu.memory_space<vmem>>, vector<8x128xf32>
    tpu.vector_store %arg1[%c0_1, %c0_2], %1 {strides = array<i32>} : memref<8x128xf32, #tpu.memory_space<vmem>>, vector<8x128xf32>,
    return
  }
}

</mosaic_0001>

<bundles_post_ra>
// kernel: tpu_custom_call.1
= control target key start
LH: loop header
LB: loop body
LE: loop exit
PB: predicated region body
PF: predicated region fallthrough
CT: control target
= control target key end

     0   :  { %6 = vsyncpa [#allocation3], 0  ;;  %s115_s0 = inlined_call_operand.hbm [shape: f32[8,128], index: 0, kind: input, shape index: {}]   ;;  %s116_s1 = inlined_call_operand.hbm [shape: f32[8,128], index: 1, kind: output, shape index: {}]  }
   0x1   :  { %7 = vsyncpa [#allocation4], 0  ;;  %s13_s8 = sshll.u32 %s115_s0, 4  ;;  %s97_s9 = smov [#allocation2]   ;;  %s14_s8 = int_to_ptr.hbm [resolvable:$true] %s13_s8 }
   0x2   :  { %s15_s10 = sshll.u32 %s97_s9, 4  ;;  %s16_s10 = int_to_ptr.vmem [resolvable:$true] %s15_s10 }
   0x3   :  { %18 = dma.hbm_to_vmem [thread:$0]  %s14_s8, 128, %s16_s10, [#allocation3]  }
   0x4   :  { %93 = dma.done.wait [#allocation3], 128  }
   0x5   :  { %94 = vsyncadd [#allocation3], 4294967168  ;;  %s98_s11 = smov [#allocation5]   ;;  %s33_s15 = sshll.u32 %s116_s1, 4  ;;  %v23_v0 = vld [vmem:[#allocation2] sm:$0xff]  ;;  %s34_s15 = int_to_ptr.hbm [resolvable:$true] %s33_s15 }
   0x6   :  { %s31_s12 = sshll.u32 %s98_s11, 4  ;;  %v24_v1 = vrot.slane %v23_v0, 7  ;;  %s32_s12 = int_to_ptr.vmem [resolvable:$true] %s31_s12 }
   0x8   :  { %25 = vst [vmem:[#allocation5] sm:$0xff] %v24_v1 }
   0x9   :  { %36 = dma.vmem_to_hbm [thread:$0]  %s32_s12, 128, %s34_s15, [#allocation4]  }
   0xa   :  { %95 = dma.done.wait [#allocation4], 128  }
   0xb   :  { %96 = vsyncadd [#allocation4], 4294967168 }
   0xc   :  { %41 = vsyncpa [#allocation3], 1 }
   0xd   :  { %42 = vsyncpa [#allocation4], 1 }

</bundles_post_ra>
